<compile_context>
chip_gen: v6e
topology: v6e:2x2x1
jax: 0.10.0
libtpu: 0.0.40
codegen_flags: <defaults>
</compile_context>

<pallas_src>
import math

import jax
import jax.numpy as jnp
from jax.experimental import pallas as pl
from jax.experimental.pallas import tpu as pltpu

# y = 0.5*x*(1 + tanh(s*(x + c*x^3)))  ==  x * sigmoid(2*s*x + 2*s*c*x^3)
_K1 = 2.0 * math.sqrt(2.0 / math.pi)
_K2 = 2.0 * math.sqrt(2.0 / math.pi) * 0.044715


def _make_gelu_kernel(compute_dtype):
    def kernel(x_ref, o_ref):
        k1 = jnp.asarray(_K1, compute_dtype)
        k2 = jnp.asarray(_K2, compute_dtype)
        x = x_ref[...].astype(compute_dtype)      # no-op when dtypes match
        z = x * (k2 * (x * x) + k1)               # 4 VALU ops
        o_ref[...] = (x * jax.nn.sigmoid(z)).astype(o_ref.dtype)  # 1 EUP + 1 VALU
    return kernel


def _lowp_native_ok() -> bool:
    """True on chips whose VPU/EUP support bf16 math (v6e / v7x)."""
    try:
        kind = jax.devices()[0].device_kind.lower()
    except Exception:
        return False
    return ("v6" in kind) or ("v7" in kind)


def _vmem_capacity_bytes() -> int:
    try:
        info = pltpu.get_tpu_info()
        cap = int(getattr(info, "vmem_capacity_bytes", 0))
        if cap > 0:
            return cap
    except Exception:
        pass
    return 64 << 20  # conservative default (v7x-sized)


def _pick_width(n: int, max_width: int = 4096) -> int:
    """Largest power-of-two multiple of 128 (<= max_width) dividing n (n % 128 == 0)."""
    cand = max_width
    while cand >= 128:
        if n % cand == 0:
            return cand
        cand //= 2
    return 128


def gelu(x: jax.Array) -> jax.Array:
    """GPT-2 tanh-approx GELU, elementwise, any shape / float dtype."""
    if x.size == 0:
        return x

    orig_shape = x.shape
    dtype = x.dtype
    itemsize = jnp.dtype(dtype).itemsize
    n = x.size
    flat = x.reshape(-1)

    # Internal math precision: bf16-native on v6e/v7x, else f32 (matches
    # PyTorch's float op-math; mandatory on v5e which has no bf16 VPU/EUP).
    if dtype == jnp.bfloat16 and _lowp_native_ok():
        compute_dtype = jnp.bfloat16
    else:
        compute_dtype = jnp.float32
    compute_itemsize = jnp.dtype(compute_dtype).itemsize
    kernel = _make_gelu_kernel(compute_dtype)

    pieces = []
    aligned = (n // 128) * 128

    # ---- main streaming kernel on the 128-aligned prefix ---------------------
    if aligned > 0:
        main = flat if aligned == n else flat[:aligned]
        width = _pick_width(aligned)
        rows = aligned // width
        x2 = main.reshape(rows, width)

        vmem_cap = _vmem_capacity_bytes()
        # 16 MiB blocks on 128 MiB-VMEM parts (v5e/v6e), 8 MiB on v7x (64 MiB).
        target_block_bytes = (16 << 20) if vmem_cap >= (96 << 20) else (8 << 20)

        # Sublane alignment per storage dtype: f32 -> 8, bf16/f16 -> 16, 1B -> 32.
        if itemsize >= 4:
            row_align = 8
        elif itemsize == 2:
            row_align = 16
        else:
            row_align = 32

        row_bytes = width * itemsize
        total_bytes = rows * row_bytes
        tr = max(row_align, (target_block_bytes // row_bytes) // row_align * row_align)
        if total_bytes <= (2 << 20) or rows <= 2 * row_align:
            # Tiny tensor: one full-extent block (always a legal block shape).
            tr = rows
        else:
            # Keep >= ~4 pipeline steps so input-DMA / compute / output-DMA
            # overlap and both v7x TensorCores get parallel work.
            max_tr = max(row_align, (rows // 4) // row_align * row_align)
            tr = min(tr, max_tr, rows)
        grid = (pl.cdiv(rows, tr),)

        # Double-buffered in+out blocks (4) + a few compute-dtype temporaries.
        block_bytes = tr * row_bytes
        compute_block_bytes = tr * width * compute_itemsize
        vmem_limit = 4 * block_bytes + 3 * compute_block_bytes + (4 << 20)
        vmem_limit = max(8 << 20, min(vmem_limit, vmem_cap * 7 // 8))

        out2 = pl.pallas_call(
            kernel,
            out_shape=jax.ShapeDtypeStruct((rows, width), dtype),
            grid_spec=pltpu.PrefetchScalarGridSpec(
                num_scalar_prefetch=0,
                grid=grid,
                in_specs=[pl.BlockSpec((tr, width), lambda i: (i, 0))],
                out_specs=pl.BlockSpec((tr, width), lambda i: (i, 0)),
            ),
            compiler_params=pltpu.CompilerParams(
                dimension_semantics=("parallel",),
                vmem_limit_bytes=int(vmem_limit),
            ),
            cost_estimate=pl.CostEstimate(
                flops=6 * aligned,
                transcendentals=aligned,
                bytes_accessed=2 * aligned * itemsize,
            ),
        )(x2)
        pieces.append(out2.reshape(-1))

    # ---- < 128-element ragged tail: trivially small single-block call --------
    if aligned != n:
        tail = flat[aligned:].reshape(1, n - aligned)
        tail_out = pl.pallas_call(
            kernel,
            out_shape=jax.ShapeDtypeStruct(tail.shape, dtype),
        )(tail)
        pieces.append(tail_out.reshape(-1))

    out_flat = pieces[0] if len(pieces) == 1 else jnp.concatenate(pieces)
    return out_flat.reshape(orig_shape)


def _gelu_ref(x):
    # Pure-JAX reference mirroring the PyTorch forward exactly.
    return 0.5 * x * (1.0 + jnp.tanh(jnp.sqrt(2.0 / jnp.pi) * (x + 0.044715 * x ** 3)))


if __name__ == "__main__":
    key = jax.random.PRNGKey(0)

    # GPT-2-style activation tensor: (batch=2, seq=8, hidden=32)
    x = jax.random.normal(key, (2, 8, 32), dtype=jnp.float32)
    y = jax.block_until_ready(gelu(x))
    assert y.shape == x.shape and y.dtype == x.dtype
    assert jnp.allclose(y, _gelu_ref(x), atol=1e-5, rtol=1e-5), "mismatch vs reference (main)"

    # A wider hidden dim (exercises the lane-dense re-tiling path, W=4096).
    x2 = jax.random.normal(jax.random.PRNGKey(1), (2, 8, 768), dtype=jnp.float32)
    y2 = jax.block_until_ready(gelu(x2))
    assert jnp.allclose(y2, _gelu_ref(x2), atol=1e-5, rtol=1e-5), "mismatch vs reference (wide)"

    # Odd total size (exercises the aligned-prefix + tiny-tail path).
    x3 = jax.random.normal(jax.random.PRNGKey(2), (3, 7, 5), dtype=jnp.float32)
    y3 = jax.block_until_ready(gelu(x3))
    assert jnp.allclose(y3, _gelu_ref(x3), atol=1e-5, rtol=1e-5), "mismatch vs reference (odd)"

    # bf16 path (native bf16 math on v6e/v7x, f32 internal math elsewhere).
    xb = jax.random.normal(jax.random.PRNGKey(3), (2, 8, 32), dtype=jnp.bfloat16)
    yb = jax.block_until_ready(gelu(xb))
    assert yb.shape == xb.shape and yb.dtype == xb.dtype
    ref_b = _gelu_ref(xb.astype(jnp.float32))
    assert jnp.allclose(yb.astype(jnp.float32), ref_b, atol=5e-2, rtol=5e-2), "mismatch (bf16)"

    print("KERNEL_OK")
</pallas_src>

<mosaic_0001>
module attributes {stable_mosaic.version = 11 : i64} {
  func.func @kernel(%arg0: i32, %arg1: memref<1x512xf32, #tpu.memory_space<vmem>>, %arg2: memref<1x512xf32, #tpu.memory_space<vmem>>) attributes {dimension_semantics = [#tpu.dimension_semantics<parallel>], iteration_bounds = array<i64: 1>, scalar_prefetch = 0 : i64, scratch_operands = 0 : i64, tpu.core_type = #tpu.core_type<tc>, window_params = [{transform_indices = @transform_0, window_bounds = array<i64: 1, 512>}, {transform_indices = @transform_1, window_bounds = array<i64: 1, 512>}]} {
    %c0 = arith.constant 0 : index
    %c0_0 = arith.constant 0 : index
    %0 = vector.load %arg1[%c0, %c0_0] : memref<1x512xf32, #tpu.memory_space<vmem>>, vector<1x512xf32>
    %1 = arith.mulf %0, %0 : vector<1x512xf32>
    %cst = arith.constant 0.0713548139 : f32
    %2 = vector.broadcast %cst : f32 to vector<1x512xf32>
    %3 = arith.mulf %2, %1 : vector<1x512xf32>
    %cst_1 = arith.constant 1.59576917 : f32
    %4 = vector.broadcast %cst_1 : f32 to vector<1x512xf32>
    %5 = arith.addf %3, %4 : vector<1x512xf32>
    %6 = arith.mulf %0, %5 : vector<1x512xf32>
    %7 = arith.negf %6 : vector<1x512xf32>
    %8 = math.exp %7 : vector<1x512xf32>
    %cst_2 = arith.constant 1.000000e+00 : f32
    %9 = vector.broadcast %cst_2 : f32 to vector<1x512xf32>
    %10 = arith.addf %9, %8 : vector<1x512xf32>
    %11 = arith.divf %9, %10 : vector<1x512xf32>
    %12 = arith.mulf %0, %11 : vector<1x512xf32>
    %c0_3 = arith.constant 0 : index
    %c0_4 = arith.constant 0 : index
    %13 = vector.load %arg2[%c0_3, %c0_4] : memref<1x512xf32, #tpu.memory_space<vmem>>, vector<1x512xf32>
    tpu.vector_store %arg2[%c0_3, %c0_4], %12 {strides = array<i32>} : memref<1x512xf32, #tpu.memory_space<vmem>>, vector<1x512xf32>,
    return
  }
  func.func @transform_0(%arg0: i32) -> (i32, i32) {
    %c0_i32 = arith.constant 0 : i32
    %c0_i32_0 = arith.constant 0 : i32
    return %arg0, %c0_i32 : i32, i32
  }
  func.func @transform_1(%arg0: i32) -> (i32, i32) {
    %c0_i32 = arith.constant 0 : i32
    %c0_i32_0 = arith.constant 0 : i32
    return %arg0, %c0_i32 : i32, i32
  }
}

</mosaic_0001>

<bundles_post_ra>
// kernel: tpu_custom_call.1
= control target key start
LH: loop header
LB: loop body
LE: loop exit
PB: predicated region body
PF: predicated region fallthrough
CT: control target
= control target key end

     0   :  { %6 = vsyncpa [#allocation3], 0  ;;  %s122_s0 = inlined_call_operand.hbm [shape: f32[1,512], index: 0, kind: input, shape index: {}]   ;;  %s123_s1 = inlined_call_operand.hbm [shape: f32[1,512], index: 1, kind: output, shape index: {}]  }
   0x1   :  { %7 = vsyncpa [#allocation4], 0  ;;  %s104_s6 = smov [#allocation2]  }
   0x2   :  { %s14_s7 = sshll.u32 %s104_s6, 4  ;;  %s15_s7 = int_to_ptr.vmem [resolvable:$true] %s14_s7 }
   0x3   :  { %s68_s8 = scalar_lea.vmem %s15_s7, 64  ;;  %p73_p1 = scmp.lt.s32.totalorder %s15_s7, %s15_s7 }
   0x4   :  { %p69_p0 = scmp.ne.s32.totalorder %s15_s7, %s68_s8  ;;  %p74_p2 = scmp.lt.s32.totalorder %s68_s8, %s68_s8 }
   0x6   :  { %p75_p3 = por %p74_p2, %p73_p1 }
   0x8   :  { %p76_p4 = pnand %p75_p3, %p69_p0 }
   0xa   :  { %79 = shalt.err (!%p76_p4)
}
   0xb   :  { %17 = dma.hbm_to_vmem [thread:$0]  %s122_s0, 64, %s15_s7, [#allocation3]  }
   0xc   :  { %100 = dma.done.wait [#allocation3], 64  }
   0xd   :  { %101 = vsyncadd [#allocation3], 4294967232  ;;  %v21_v0 = vld [vmem:[#allocation2] sm:$0xf]  ;;  %v33_v8 = vlaneseq  ;;  %s105_s11 = smov [#allocation5]  }
   0xe   :  { %v22_v1 = vmul.f32 %v21_v0, %v21_v0  ;;  %s44_s12 = sshll.u32 %s105_s11, 4  ;;  %s45_s12 = int_to_ptr.vmem [resolvable:$true] %s44_s12 }
   0xf   :  { %vm35_vm0 = vcmp.lt.s32.totalorder %v33_v8, 512  ;;  %s80_s0 = scalar_lea.vmem %s45_s12, 64  ;;  %p85_p6 = scmp.lt.s32.totalorder %s45_s12, %s45_s12 }
  0x10   :  { %v23_v2 = vmul.f32 0.071354814, %v22_v1  ;;  %p81_p5 = scmp.ne.s32.totalorder %s45_s12, %s80_s0  ;;  %p86_p7 = scmp.lt.s32.totalorder %s80_s0, %s80_s0 }
  0x12   :  { %v24_v3 = vadd.f32 1.5957692, %v23_v2  ;;  %p87_p8 = por %p86_p7, %p85_p6 }
  0x14   :  { %v25_v4 = vmul.f32 %v24_v3, %v21_v0  ;;  %p88_p9 = pnand %p87_p8, %p81_p5 }
  0x16   :  { %v53_v5 = vmul.f32 -1.442695, %v25_v4 }
  0x18   :  { %56 = vpow2.f32 %v53_v5 }
  0x25   :  { %v57_v6 = vpop.eup %56 }
  0x26   :  { %v29_v7 = vadd.f32 1.0, %v57_v6 }
  0x28   :  { %58 = vrcp.f32 %v29_v7 }
  0x35   :  { %v59_v9 = vpop.eup %58 }
  0x36   :  { %v32_v10 = vmul.f32 %v59_v9, %v21_v0 }
  0x38   :  { %37 = vst.msk [vmem:[#allocation5] sm:$0xf] %vm35_vm0, %v32_v10 }
  0x39   :  { %91 = shalt.err (!%p88_p9)
}
  0x3a   :  { %47 = dma.vmem_to_hbm [thread:$0]  %s45_s12, 64, %s123_s1, [#allocation4]  }
  0x3b   :  { %102 = dma.done.wait [#allocation4], 64  }
  0x3c   :  { %103 = vsyncadd [#allocation4], 4294967232 }
  0x3d   :  { %51 = vsyncpa [#allocation3], 1 }
  0x3e   :  { %52 = vsyncpa [#allocation4], 1 }

</bundles_post_ra>
